<compile_context>
chip_gen: v5e
topology: v5e:2x2
jax: 0.10.0
libtpu: 0.0.40
codegen_flags: <defaults>
</compile_context>

<pallas_src>
import functools

import jax
import jax.numpy as jnp
from jax import lax
from jax.experimental import pallas as pl
from jax.experimental.pallas import tpu as pltpu

LN_EPS = 1e-5  # torch.nn.LayerNorm default


# --------------------------------------------------------------------------
# Kernel
# --------------------------------------------------------------------------
def projection_kernel(x_ref, w1_ref, b1_ref, g_ref, beta_ref, w2_ref, b2_ref,
                      o_ref, hr_ref):
    # Linear1 + LayerNorm + ReLU computed once per row tile (inner axis j == 0)
    # and stashed in a bf16 VMEM scratch, then reused for every output-feature
    # tile of Linear2.
    @pl.when(pl.program_id(1) == 0)
    def _():
        # ---- Linear 1: [tm, D_in] @ [D_in, F] + [1, F] (bf16 ops, f32 acc) ----
        x_bf = x_ref[...].astype(jnp.bfloat16)
        h = jnp.dot(x_bf, w1_ref[...],
                    preferred_element_type=jnp.float32) + b1_ref[...]

        # ---- LayerNorm (f32): var = E[h^2] - mean^2, two independent reduces ----
        mean = jnp.mean(h, axis=-1, keepdims=True)
        ex2 = jnp.mean(h * h, axis=-1, keepdims=True)
        var = jnp.maximum(ex2 - mean * mean, 0.0)
        hn = (h - mean) * lax.rsqrt(var + LN_EPS)
        hn = hn * g_ref[...] + beta_ref[...]

        # ---- ReLU -> bf16 scratch (operand dtype for the second MXU pass) ----
        hr_ref[...] = jnp.maximum(hn, 0.0).astype(jnp.bfloat16)

    # ---- Linear 2: [tm, F] @ [F, tn] + [1, tn] (bf16 ops, f32 acc) ----
    out = jnp.dot(hr_ref[...], w2_ref[...],
                  preferred_element_type=jnp.float32) + b2_ref[...]
    o_ref[...] = out.astype(o_ref.dtype)


# --------------------------------------------------------------------------
# Tiling heuristics
# --------------------------------------------------------------------------
def _num_tensorcores() -> int:
    """2 on megacore parts (v4 / v5p / v7x), else 1."""
    try:
        kind = jax.devices()[0].device_kind.lower()
    except Exception:
        return 1
    return 2 if ("v7" in kind or "v4" in kind or "v5p" in kind) else 1


def _pick_tm(M: int, F: int, num_tc: int) -> int:
    """Row tile: whole batch on 1-TC parts when small; split across 2 TCs on
    megacore parts; capped so the f32 [tm, F] intermediates fit VMEM."""
    if M <= 8:
        return M
    cap = 512 if F < 4096 else 256
    tiles = num_tc if (num_tc > 1 and M >= 8 * num_tc) else 1
    tm = min(cap, pl.cdiv(M, tiles))
    if tm < M:  # (8,128) rule: block dim must be a multiple of 8 (or full dim)
        tm = min(((tm + 7) // 8) * 8, cap)
    return tm


def _pick_tn(F: int) -> int:
    """Output-feature tile for Linear2: fully resident W2 when small, else a
    lane-dense 512-wide streamed tile."""
    return F if F <= 2048 else 512


def _vmem_limit_bytes(tm, tn, d_in, F, x_itemsize, out_itemsize, nj) -> int:
    w2_bufs = 1 if nj == 1 else 2
    need = (
        2 * tm * d_in * x_itemsize        # x tile (double-buffered)
        + d_in * F * 2                    # W1 bf16 (single-buffered)
        + 3 * F * 4                       # b1 / gamma / beta (f32)
        + w2_bufs * F * tn * 2            # W2 tile(s) bf16
        + 2 * tn * 4                      # b2 tile
        + 2 * tm * tn * out_itemsize      # output tile (double-buffered)
        + tm * F * 2                      # hr scratch (bf16)
        + 3 * tm * F * 4                  # f32 LN intermediates headroom
    )
    return min(int(need * 1.25) + (2 << 20), 64 << 20)


# --------------------------------------------------------------------------
# pallas_call wrapper
# --------------------------------------------------------------------------
@functools.partial(
    jax.jit,
    static_argnames=("tm", "tn", "out_dtype", "single_buffer_consts"))
def _projection_call(x, w1, b1, gamma, beta, w2, b2, *, tm, tn, out_dtype,
                     single_buffer_consts):
    M, d_in = x.shape
    F = w1.shape[1]
    nm = pl.cdiv(M, tm)
    nj = pl.cdiv(F, tn)

    # Small params presented lane-dense as (1, F); negligible cost.
    b1_2d = b1.reshape(1, F).astype(jnp.float32)
    g_2d = gamma.reshape(1, F).astype(jnp.float32)
    beta_2d = beta.reshape(1, F).astype(jnp.float32)
    b2_2d = b2.reshape(1, F).astype(jnp.float32)

    const_mode = pl.Buffered(1) if single_buffer_consts else None
    w2_mode = const_mode if nj == 1 else None  # stream (double-buffer) if tiled

    def spec(shape, imap, mode=None):
        if mode is None:
            return pl.BlockSpec(shape, imap)
        return pl.BlockSpec(shape, imap, pipeline_mode=mode)

    in_specs = [
        spec((tm, d_in), lambda i, j: (i, 0)),                # x row tile
        spec((d_in, F), lambda i, j: (0, 0), const_mode),     # W1 (resident bf16)
        spec((1, F), lambda i, j: (0, 0), const_mode),        # b1
        spec((1, F), lambda i, j: (0, 0), const_mode),        # LN gamma
        spec((1, F), lambda i, j: (0, 0), const_mode),        # LN beta
        spec((F, tn), lambda i, j: (0, j), w2_mode),          # W2 N-tile (bf16)
        spec((1, tn), lambda i, j: (0, j), w2_mode),          # b2 N-tile
    ]
    out_spec = pl.BlockSpec((tm, tn), lambda i, j: (i, j))

    out_itemsize = jnp.dtype(out_dtype).itemsize
    cost = pl.CostEstimate(
        flops=2 * M * F * (d_in + F),
        transcendentals=M,  # one rsqrt per row
        bytes_accessed=(x.size * x.dtype.itemsize
                        + w1.size * w1.dtype.itemsize
                        + w2.size * w2.dtype.itemsize
                        + 4 * F * 4
                        + M * F * out_itemsize),
    )

    return pl.pallas_call(
        projection_kernel,
        out_shape=jax.ShapeDtypeStruct((M, F), out_dtype),
        grid=(nm, nj),
        in_specs=in_specs,
        out_specs=out_spec,
        scratch_shapes=[pltpu.VMEM((tm, F), jnp.bfloat16)],   # post-ReLU acts
        compiler_params=pltpu.CompilerParams(
            dimension_semantics=("parallel", "arbitrary"),
            vmem_limit_bytes=_vmem_limit_bytes(
                tm, tn, d_in, F, x.dtype.itemsize, out_itemsize, nj)),
        cost_estimate=cost,
    )(x, w1, b1_2d, g_2d, beta_2d, w2, b2_2d)


def prepare_weights(w1, w2):
    """One-time (init-time) cast of matmul weights to bf16 -- OUTSIDE any jit,
    so the per-call kernel never re-reads / re-writes f32 weights."""
    return jnp.asarray(w1, jnp.bfloat16), jnp.asarray(w2, jnp.bfloat16)


def projection(x, w1_bf16, b1, gamma, beta, w2_bf16, b2, *, tm=None, tn=None,
               out_dtype=None):
    """Fused Projection forward. w1_bf16 / w2_bf16 should be pre-cast with
    prepare_weights(). Pass out_dtype=jnp.bfloat16 to halve writeback bytes."""
    M, d_in = x.shape
    F = w1_bf16.shape[1]
    if tm is None:
        tm = _pick_tm(M, F, _num_tensorcores())
    if tn is None:
        tn = _pick_tn(F)
    if out_dtype is None:
        out_dtype = x.dtype
    kwargs = dict(tm=int(tm), tn=int(tn), out_dtype=jnp.dtype(out_dtype))
    try:
        return _projection_call(x, w1_bf16, b1, gamma, beta, w2_bf16, b2,
                                single_buffer_consts=True, **kwargs)
    except Exception:
        # Older jax without BlockSpec.pipeline_mode support: fall back to the
        # default double-buffered specs (same numerics, slightly more VMEM).
        return _projection_call(x, w1_bf16, b1, gamma, beta, w2_bf16, b2,
                                single_buffer_consts=False, **kwargs)


# --------------------------------------------------------------------------
# References
# --------------------------------------------------------------------------
def reference_f32(x, w1, b1, gamma, beta, w2, b2):
    """Pure-f32 reference (module semantics)."""
    h = x @ w1 + b1
    mean = jnp.mean(h, axis=-1, keepdims=True)
    var = jnp.mean((h - mean) ** 2, axis=-1, keepdims=True)
    hn = (h - mean) / jnp.sqrt(var + LN_EPS) * gamma + beta
    hr = jnp.maximum(hn, 0.0)
    return hr @ w2 + b2


def reference_mixed(x, w1, b1, gamma, beta, w2, b2):
    """Reference with the kernel's numerics: bf16 matmul operands, f32 acc."""
    h = jnp.dot(x.astype(jnp.bfloat16), w1.astype(jnp.bfloat16),
                preferred_element_type=jnp.float32) + b1
    mean = jnp.mean(h, axis=-1, keepdims=True)
    var = jnp.mean((h - mean) ** 2, axis=-1, keepdims=True)
    hn = (h - mean) * lax.rsqrt(var + LN_EPS) * gamma + beta
    hr = jnp.maximum(hn, 0.0)
    return jnp.dot(hr.astype(jnp.bfloat16), w2.astype(jnp.bfloat16),
                   preferred_element_type=jnp.float32) + b2


# --------------------------------------------------------------------------
# Example / self-test
# --------------------------------------------------------------------------
if __name__ == "__main__":
    # Small shapes consistent with the module: input_size=32, features_size=128,
    # batch of 16 rows.
    M, D_IN, FEAT = 16, 32, 128

    key = jax.random.PRNGKey(0)
    kx, kw1, kb1, kw2, kb2 = jax.random.split(key, 5)

    x = jax.random.normal(kx, (M, D_IN), dtype=jnp.float32)

    # Deterministic synthetic parameters (PyTorch-like uniform init ranges).
    lim1 = 1.0 / (D_IN ** 0.5)
    w1 = jax.random.uniform(kw1, (D_IN, FEAT), minval=-lim1, maxval=lim1,
                            dtype=jnp.float32)
    b1 = jax.random.uniform(kb1, (FEAT,), minval=-lim1, maxval=lim1,
                            dtype=jnp.float32)
    gamma = jnp.ones((FEAT,), dtype=jnp.float32)   # LayerNorm weight init
    beta = jnp.zeros((FEAT,), dtype=jnp.float32)   # LayerNorm bias init
    lim2 = 1.0 / (FEAT ** 0.5)
    w2 = jax.random.uniform(kw2, (FEAT, FEAT), minval=-lim2, maxval=lim2,
                            dtype=jnp.float32)
    b2 = jax.random.uniform(kb2, (FEAT,), minval=-lim2, maxval=lim2,
                            dtype=jnp.float32)

    # One-time init cast of the weights (outside jit).
    w1_bf, w2_bf = prepare_weights(w1, w2)

    out = projection(x, w1_bf, b1, gamma, beta, w2_bf, b2)
    out = jax.block_until_ready(out)
    assert out.shape == (M, FEAT)

    # Tight check against a reference with matching (bf16-operand) numerics.
    ref_mix = reference_mixed(x, w1, b1, gamma, beta, w2, b2)
    assert jnp.allclose(out, ref_mix, atol=5e-3, rtol=5e-3), \
        "mismatch vs mixed-precision reference"

    # Loose check against the pure-f32 module semantics (bf16 rounding only).
    ref_f32 = reference_f32(x, w1, b1, gamma, beta, w2, b2)
    assert jnp.allclose(out, ref_f32, atol=1e-1, rtol=1e-1), \
        "mismatch vs f32 reference"

    print("KERNEL_OK")
</pallas_src>

<mosaic_0001>
module attributes {stable_mosaic.version = 11 : i64} {
  func.func @projection_kernel(%arg0: i32, %arg1: i32, %arg2: memref<16x32xf32, #tpu.memory_space<vmem>>, %arg3: memref<32x128xbf16, #tpu.memory_space<vmem>>, %arg4: memref<1x128xf32, #tpu.memory_space<vmem>>, %arg5: memref<1x128xf32, #tpu.memory_space<vmem>>, %arg6: memref<1x128xf32, #tpu.memory_space<vmem>>, %arg7: memref<128x128xbf16, #tpu.memory_space<vmem>>, %arg8: memref<1x128xf32, #tpu.memory_space<vmem>>, %arg9: memref<16x128xf32, #tpu.memory_space<vmem>>, %arg10: memref<16x128xbf16, #tpu.memory_space<vmem>>) attributes {dimension_semantics = [#tpu.dimension_semantics<parallel>, #tpu.dimension_semantics<arbitrary>], iteration_bounds = array<i64: 1, 1>, scalar_prefetch = 0 : i64, scratch_operands = 1 : i64, tpu.core_type = #tpu.core_type<tc>, window_params = [{transform_indices = @transform_0, window_bounds = array<i64: 16, 32>}, {pipeline_mode = #tpu.pipeline_mode<synchronous>, transform_indices = @transform_1, window_bounds = array<i64: 32, 128>}, {pipeline_mode = #tpu.pipeline_mode<synchronous>, transform_indices = @transform_2, window_bounds = array<i64: 1, 128>}, {pipeline_mode = #tpu.pipeline_mode<synchronous>, transform_indices = @transform_3, window_bounds = array<i64: 1, 128>}, {pipeline_mode = #tpu.pipeline_mode<synchronous>, transform_indices = @transform_4, window_bounds = array<i64: 1, 128>}, {pipeline_mode = #tpu.pipeline_mode<synchronous>, transform_indices = @transform_5, window_bounds = array<i64: 128, 128>}, {pipeline_mode = #tpu.pipeline_mode<synchronous>, transform_indices = @transform_6, window_bounds = array<i64: 1, 128>}, {transform_indices = @transform_7, window_bounds = array<i64: 16, 128>}]} {
    %c0_i32 = arith.constant 0 : i32
    %0 = arith.cmpi eq, %arg1, %c0_i32 : i32
    %1 = arith.extui %0 : i1 to i32
    %c0_i32_0 = arith.constant 0 : i32
    %2 = arith.cmpi ne, %1, %c0_i32_0 : i32
    scf.if %2 {
      %c0_8 = arith.constant 0 : index
      %c0_9 = arith.constant 0 : index
      %10 = vector.load %arg2[%c0_8, %c0_9] : memref<16x32xf32, #tpu.memory_space<vmem>>, vector<16x32xf32>
      %11 = arith.truncf %10 : vector<16x32xf32> to vector<16x32xbf16>
      %c0_10 = arith.constant 0 : index
      %c0_11 = arith.constant 0 : index
      %12 = vector.load %arg3[%c0_10, %c0_11] : memref<32x128xbf16, #tpu.memory_space<vmem>>, vector<32x128xbf16>
      %cst_12 = arith.constant dense<0.000000e+00> : vector<16x128xf32>
      %13 = tpu.matmul %11, %12, %cst_12 {dimension_numbers = #tpu.dot_dimension_numbers<[1], [0], [0], [1], [0, 0, 1, 1], [], []>} : vector<16x32xbf16>, vector<32x128xbf16>, vector<16x128xf32> -> vector<16x128xf32>
      %c0_13 = arith.constant 0 : index
      %c0_14 = arith.constant 0 : index
      %14 = vector.load %arg4[%c0_13, %c0_14] : memref<1x128xf32, #tpu.memory_space<vmem>>, vector<1x128xf32>
      %15 = vector.broadcast %14 : vector<1x128xf32> to vector<16x128xf32>
      %16 = arith.addf %13, %15 : vector<16x128xf32>
      %cst_15 = arith.constant dense<0.000000e+00> : vector<16xf32>
      %17 = vector.multi_reduction <add>, %16, %cst_15 [1] : vector<16x128xf32> to vector<16xf32>
      %18 = vector.shape_cast %17 : vector<16xf32> to vector<16x1xf32>
      %cst_16 = arith.constant 1.280000e+02 : f32
      %19 = vector.broadcast %cst_16 : f32 to vector<16x1xf32>
      %20 = arith.divf %18, %19 : vector<16x1xf32>
      %21 = arith.mulf %16, %16 : vector<16x128xf32>
      %cst_17 = arith.constant dense<0.000000e+00> : vector<16xf32>
      %22 = vector.multi_reduction <add>, %21, %cst_17 [1] : vector<16x128xf32> to vector<16xf32>
      %23 = vector.shape_cast %22 : vector<16xf32> to vector<16x1xf32>
      %cst_18 = arith.constant 1.280000e+02 : f32
      %24 = vector.broadcast %cst_18 : f32 to vector<16x1xf32>
      %25 = arith.divf %23, %24 : vector<16x1xf32>
      %26 = arith.mulf %20, %20 : vector<16x1xf32>
      %27 = arith.subf %25, %26 : vector<16x1xf32>
      %cst_19 = arith.constant 0.000000e+00 : f32
      %28 = vector.broadcast %cst_19 : f32 to vector<16x1xf32>
      %29 = arith.maximumf %27, %28 : vector<16x1xf32>
      %30 = vector.broadcast %20 : vector<16x1xf32> to vector<16x128xf32>
      %31 = arith.subf %16, %30 : vector<16x128xf32>
      %cst_20 = arith.constant 9.99999974E-6 : f32
      %32 = vector.broadcast %cst_20 : f32 to vector<16x1xf32>
      %33 = arith.addf %29, %32 : vector<16x1xf32>
      %34 = math.rsqrt %33 : vector<16x1xf32>
      %35 = vector.broadcast %34 : vector<16x1xf32> to vector<16x128xf32>
      %36 = arith.mulf %31, %35 : vector<16x128xf32>
      %c0_21 = arith.constant 0 : index
      %c0_22 = arith.constant 0 : index
      %37 = vector.load %arg5[%c0_21, %c0_22] : memref<1x128xf32, #tpu.memory_space<vmem>>, vector<1x128xf32>
      %38 = vector.broadcast %37 : vector<1x128xf32> to vector<16x128xf32>
      %39 = arith.mulf %36, %38 : vector<16x128xf32>
      %c0_23 = arith.constant 0 : index
      %c0_24 = arith.constant 0 : index
      %40 = vector.load %arg6[%c0_23, %c0_24] : memref<1x128xf32, #tpu.memory_space<vmem>>, vector<1x128xf32>
      %41 = vector.broadcast %40 : vector<1x128xf32> to vector<16x128xf32>
      %42 = arith.addf %39, %41 : vector<16x128xf32>
      %cst_25 = arith.constant 0.000000e+00 : f32
      %43 = vector.broadcast %cst_25 : f32 to vector<16x128xf32>
      %44 = arith.maximumf %42, %43 : vector<16x128xf32>
      %45 = arith.truncf %44 : vector<16x128xf32> to vector<16x128xbf16>
      %c0_26 = arith.constant 0 : index
      %c0_27 = arith.constant 0 : index
      %46 = vector.load %arg10[%c0_26, %c0_27] : memref<16x128xbf16, #tpu.memory_space<vmem>>, vector<16x128xbf16>
      tpu.vector_store %arg10[%c0_26, %c0_27], %45 {strides = array<i32>} : memref<16x128xbf16, #tpu.memory_space<vmem>>, vector<16x128xbf16>,
    } else {
    }
    %c0 = arith.constant 0 : index
    %c0_1 = arith.constant 0 : index
    %3 = vector.load %arg10[%c0, %c0_1] : memref<16x128xbf16, #tpu.memory_space<vmem>>, vector<16x128xbf16>
    %c0_2 = arith.constant 0 : index
    %c0_3 = arith.constant 0 : index
    %4 = vector.load %arg7[%c0_2, %c0_3] : memref<128x128xbf16, #tpu.memory_space<vmem>>, vector<128x128xbf16>
    %cst = arith.constant dense<0.000000e+00> : vector<16x128xf32>
    %5 = tpu.matmul %3, %4, %cst {dimension_numbers = #tpu.dot_dimension_numbers<[1], [0], [0], [1], [0, 0, 1, 1], [], []>} : vector<16x128xbf16>, vector<128x128xbf16>, vector<16x128xf32> -> vector<16x128xf32>
    %c0_4 = arith.constant 0 : index
    %c0_5 = arith.constant 0 : index
    %6 = vector.load %arg8[%c0_4, %c0_5] : memref<1x128xf32, #tpu.memory_space<vmem>>, vector<1x128xf32>
    %7 = vector.broadcast %6 : vector<1x128xf32> to vector<16x128xf32>
    %8 = arith.addf %5, %7 : vector<16x128xf32>
    %c0_6 = arith.constant 0 : index
    %c0_7 = arith.constant 0 : index
    %9 = vector.load %arg9[%c0_6, %c0_7] : memref<16x128xf32, #tpu.memory_space<vmem>>, vector<16x128xf32>
    tpu.vector_store %arg9[%c0_6, %c0_7], %8 {strides = array<i32>} : memref<16x128xf32, #tpu.memory_space<vmem>>, vector<16x128xf32>,
    return
  }
  func.func @transform_0(%arg0: i32, %arg1: i32) -> (i32, i32) {
    %c0_i32 = arith.constant 0 : i32
    %c0_i32_0 = arith.constant 0 : i32
    return %arg0, %c0_i32 : i32, i32
  }
  func.func @transform_1(%arg0: i32, %arg1: i32) -> (i32, i32) {
    %c0_i32 = arith.constant 0 : i32
    %c0_i32_0 = arith.constant 0 : i32
    %c0_i32_1 = arith.constant 0 : i32
    return %c0_i32, %c0_i32_0 : i32, i32
  }
  func.func @transform_2(%arg0: i32, %arg1: i32) -> (i32, i32) {
    %c0_i32 = arith.constant 0 : i32
    %c0_i32_0 = arith.constant 0 : i32
    %c0_i32_1 = arith.constant 0 : i32
    return %c0_i32, %c0_i32_0 : i32, i32
  }
  func.func @transform_3(%arg0: i32, %arg1: i32) -> (i32, i32) {
    %c0_i32 = arith.constant 0 : i32
    %c0_i32_0 = arith.constant 0 : i32
    %c0_i32_1 = arith.constant 0 : i32
    return %c0_i32, %c0_i32_0 : i32, i32
  }
  func.func @transform_4(%arg0: i32, %arg1: i32) -> (i32, i32) {
    %c0_i32 = arith.constant 0 : i32
    %c0_i32_0 = arith.constant 0 : i32
    %c0_i32_1 = arith.constant 0 : i32
    return %c0_i32, %c0_i32_0 : i32, i32
  }
  func.func @transform_5(%arg0: i32, %arg1: i32) -> (i32, i32) {
    %c0_i32 = arith.constant 0 : i32
    %c0_i32_0 = arith.constant 0 : i32
    return %c0_i32, %arg1 : i32, i32
  }
  func.func @transform_6(%arg0: i32, %arg1: i32) -> (i32, i32) {
    %c0_i32 = arith.constant 0 : i32
    %c0_i32_0 = arith.constant 0 : i32
    return %c0_i32, %arg1 : i32, i32
  }
  func.func @transform_7(%arg0: i32, %arg1: i32) -> (i32, i32) {
    %c0_i32 = arith.constant 0 : i32
    return %arg0, %arg1 : i32, i32
  }
}

module attributes {stable_mosaic.version = 11 : i64} {
  func.func @projection_kernel(%arg0: i32, %arg1: i32, %arg2: memref<16x32xf32, #tpu.memory_space<vmem>>, %arg3: memref<32x128xbf16, #tpu.memory_space<vmem>>, %arg4: memref<1x128xf32, #tpu.memory_space<vmem>>, %arg5: memref<1x128xf32, #tpu.memory_space<vmem>>, %arg6: memref<1x128xf32, #tpu.memory_space<vmem>>, %arg7: memref<128x128xbf16, #tpu.memory_space<vmem>>, %arg8: memref<1x128xf32, #tpu.memory_space<vmem>>, %arg9: memref<16x128xf32, #tpu.memory_space<vmem>>, %arg10: memref<16x128xbf16, #tpu.memory_space<vmem>>) attributes {dimension_semantics = [#tpu.dimension_semantics<parallel>, #tpu.dimension_semantics<arbitrary>], iteration_bounds = array<i64: 1, 1>, scalar_prefetch = 0 : i64, scratch_operands = 1 : i64, tpu.core_type = #tpu.core_type<tc>, window_params = [{transform_indices = @transform_0, window_bounds = array<i64: 16, 32>}, {pipeline_mode = #tpu.pipeline_mode<synchronous>, transform_indices = @transform_1, window_bounds = array<i64: 32, 128>}, {pipeline_mode = #tpu.pipeline_mode<synchronous>, transform_indices = @transform_2, window_bounds = array<i64: 1, 128>}, {pipeline_mode = #tpu.pipeline_mode<synchronous>, transform_indices = @transform_3, window_bounds = array<i64: 1, 128>}, {pipeline_mode = #tpu.pipeline_mode<synchronous>, transform_indices = @transform_4, window_bounds = array<i64: 1, 128>}, {transform_indices = @transform_5, window_bounds = array<i64: 128, 128>}, {transform_indices = @transform_6, window_bounds = array<i64: 1, 128>}, {transform_indices = @transform_7, window_bounds = array<i64: 16, 128>}]} {
    %c0_i32 = arith.constant 0 : i32
    %0 = arith.cmpi eq, %arg1, %c0_i32 : i32
    %1 = arith.extui %0 : i1 to i32
    %c0_i32_0 = arith.constant 0 : i32
    %2 = arith.cmpi ne, %1, %c0_i32_0 : i32
    scf.if %2 {
      %c0_8 = arith.constant 0 : index
      %c0_9 = arith.constant 0 : index
      %10 = vector.load %arg2[%c0_8, %c0_9] : memref<16x32xf32, #tpu.memory_space<vmem>>, vector<16x32xf32>
      %11 = arith.truncf %10 : vector<16x32xf32> to vector<16x32xbf16>
      %c0_10 = arith.constant 0 : index
      %c0_11 = arith.constant 0 : index
      %12 = vector.load %arg3[%c0_10, %c0_11] : memref<32x128xbf16, #tpu.memory_space<vmem>>, vector<32x128xbf16>
      %cst_12 = arith.constant dense<0.000000e+00> : vector<16x128xf32>
      %13 = tpu.matmul %11, %12, %cst_12 {dimension_numbers = #tpu.dot_dimension_numbers<[1], [0], [0], [1], [0, 0, 1, 1], [], []>} : vector<16x32xbf16>, vector<32x128xbf16>, vector<16x128xf32> -> vector<16x128xf32>
      %c0_13 = arith.constant 0 : index
      %c0_14 = arith.constant 0 : index
      %14 = vector.load %arg4[%c0_13, %c0_14] : memref<1x128xf32, #tpu.memory_space<vmem>>, vector<1x128xf32>
      %15 = vector.broadcast %14 : vector<1x128xf32> to vector<16x128xf32>
      %16 = arith.addf %13, %15 : vector<16x128xf32>
      %cst_15 = arith.constant dense<0.000000e+00> : vector<16xf32>
      %17 = vector.multi_reduction <add>, %16, %cst_15 [1] : vector<16x128xf32> to vector<16xf32>
      %18 = vector.shape_cast %17 : vector<16xf32> to vector<16x1xf32>
      %cst_16 = arith.constant 1.280000e+02 : f32
      %19 = vector.broadcast %cst_16 : f32 to vector<16x1xf32>
      %20 = arith.divf %18, %19 : vector<16x1xf32>
      %21 = arith.mulf %16, %16 : vector<16x128xf32>
      %cst_17 = arith.constant dense<0.000000e+00> : vector<16xf32>
      %22 = vector.multi_reduction <add>, %21, %cst_17 [1] : vector<16x128xf32> to vector<16xf32>
      %23 = vector.shape_cast %22 : vector<16xf32> to vector<16x1xf32>
      %cst_18 = arith.constant 1.280000e+02 : f32
      %24 = vector.broadcast %cst_18 : f32 to vector<16x1xf32>
      %25 = arith.divf %23, %24 : vector<16x1xf32>
      %26 = arith.mulf %20, %20 : vector<16x1xf32>
      %27 = arith.subf %25, %26 : vector<16x1xf32>
      %cst_19 = arith.constant 0.000000e+00 : f32
      %28 = vector.broadcast %cst_19 : f32 to vector<16x1xf32>
      %29 = arith.maximumf %27, %28 : vector<16x1xf32>
      %30 = vector.broadcast %20 : vector<16x1xf32> to vector<16x128xf32>
      %31 = arith.subf %16, %30 : vector<16x128xf32>
      %cst_20 = arith.constant 9.99999974E-6 : f32
      %32 = vector.broadcast %cst_20 : f32 to vector<16x1xf32>
      %33 = arith.addf %29, %32 : vector<16x1xf32>
      %34 = math.rsqrt %33 : vector<16x1xf32>
      %35 = vector.broadcast %34 : vector<16x1xf32> to vector<16x128xf32>
      %36 = arith.mulf %31, %35 : vector<16x128xf32>
      %c0_21 = arith.constant 0 : index
      %c0_22 = arith.constant 0 : index
      %37 = vector.load %arg5[%c0_21, %c0_22] : memref<1x128xf32, #tpu.memory_space<vmem>>, vector<1x128xf32>
      %38 = vector.broadcast %37 : vector<1x128xf32> to vector<16x128xf32>
      %39 = arith.mulf %36, %38 : vector<16x128xf32>
      %c0_23 = arith.constant 0 : index
      %c0_24 = arith.constant 0 : index
      %40 = vector.load %arg6[%c0_23, %c0_24] : memref<1x128xf32, #tpu.memory_space<vmem>>, vector<1x128xf32>
      %41 = vector.broadcast %40 : vector<1x128xf32> to vector<16x128xf32>
      %42 = arith.addf %39, %41 : vector<16x128xf32>
      %cst_25 = arith.constant 0.000000e+00 : f32
      %43 = vector.broadcast %cst_25 : f32 to vector<16x128xf32>
      %44 = arith.maximumf %42, %43 : vector<16x128xf32>
      %45 = arith.truncf %44 : vector<16x128xf32> to vector<16x128xbf16>
      %c0_26 = arith.constant 0 : index
      %c0_27 = arith.constant 0 : index
      %46 = vector.load %arg10[%c0_26, %c0_27] : memref<16x128xbf16, #tpu.memory_space<vmem>>, vector<16x128xbf16>
      tpu.vector_store %arg10[%c0_26, %c0_27], %45 {strides = array<i32>} : memref<16x128xbf16, #tpu.memory_space<vmem>>, vector<16x128xbf16>,
    } else {
    }
    %c0 = arith.constant 0 : index
    %c0_1 = arith.constant 0 : index
    %3 = vector.load %arg10[%c0, %c0_1] : memref<16x128xbf16, #tpu.memory_space<vmem>>, vector<16x128xbf16>
    %c0_2 = arith.constant 0 : index
    %c0_3 = arith.constant 0 : index
    %4 = vector.load %arg7[%c0_2, %c0_3] : memref<128x128xbf16, #tpu.memory_space<vmem>>, vector<128x128xbf16>
    %cst = arith.constant dense<0.000000e+00> : vector<16x128xf32>
    %5 = tpu.matmul %3, %4, %cst {dimension_numbers = #tpu.dot_dimension_numbers<[1], [0], [0], [1], [0, 0, 1, 1], [], []>} : vector<16x128xbf16>, vector<128x128xbf16>, vector<16x128xf32> -> vector<16x128xf32>
    %c0_4 = arith.constant 0 : index
    %c0_5 = arith.constant 0 : index
    %6 = vector.load %arg8[%c0_4, %c0_5] : memref<1x128xf32, #tpu.memory_space<vmem>>, vector<1x128xf32>
    %7 = vector.broadcast %6 : vector<1x128xf32> to vector<16x128xf32>
    %8 = arith.addf %5, %7 : vector<16x128xf32>
    %c0_6 = arith.constant 0 : index
    %c0_7 = arith.constant 0 : index
    %9 = vector.load %arg9[%c0_6, %c0_7] : memref<16x128xf32, #tpu.memory_space<vmem>>, vector<16x128xf32>
    tpu.vector_store %arg9[%c0_6, %c0_7], %8 {strides = array<i32>} : memref<16x128xf32, #tpu.memory_space<vmem>>, vector<16x128xf32>,
    return
  }
  func.func @transform_0(%arg0: i32, %arg1: i32) -> (i32, i32) {
    %c0_i32 = arith.constant 0 : i32
    %c0_i32_0 = arith.constant 0 : i32
    return %arg0, %c0_i32 : i32, i32
  }
  func.func @transform_1(%arg0: i32, %arg1: i32) -> (i32, i32) {
    %c0_i32 = arith.constant 0 : i32
    %c0_i32_0 = arith.constant 0 : i32
    %c0_i32_1 = arith.constant 0 : i32
    return %c0_i32, %c0_i32_0 : i32, i32
  }
  func.func @transform_2(%arg0: i32, %arg1: i32) -> (i32, i32) {
    %c0_i32 = arith.constant 0 : i32
    %c0_i32_0 = arith.constant 0 : i32
    %c0_i32_1 = arith.constant 0 : i32
    return %c0_i32, %c0_i32_0 : i32, i32
  }
  func.func @transform_3(%arg0: i32, %arg1: i32) -> (i32, i32) {
    %c0_i32 = arith.constant 0 : i32
    %c0_i32_0 = arith.constant 0 : i32
    %c0_i32_1 = arith.constant 0 : i32
    return %c0_i32, %c0_i32_0 : i32, i32
  }
  func.func @transform_4(%arg0: i32, %arg1: i32) -> (i32, i32) {
    %c0_i32 = arith.constant 0 : i32
    %c0_i32_0 = arith.constant 0 : i32
    %c0_i32_1 = arith.constant 0 : i32
    return %c0_i32, %c0_i32_0 : i32, i32
  }
  func.func @transform_5(%arg0: i32, %arg1: i32) -> (i32, i32) {
    %c0_i32 = arith.constant 0 : i32
    %c0_i32_0 = arith.constant 0 : i32
    return %c0_i32, %arg1 : i32, i32
  }
  func.func @transform_6(%arg0: i32, %arg1: i32) -> (i32, i32) {
    %c0_i32 = arith.constant 0 : i32
    %c0_i32_0 = arith.constant 0 : i32
    return %c0_i32, %arg1 : i32, i32
  }
  func.func @transform_7(%arg0: i32, %arg1: i32) -> (i32, i32) {
    %c0_i32 = arith.constant 0 : i32
    return %arg0, %arg1 : i32, i32
  }
}

</mosaic_0001>

<bundles_post_ra>
// kernel: _projection_call.1
= control target key start
LH: loop header
LB: loop body
LE: loop exit
PB: predicated region body
PF: predicated region fallthrough
CT: control target
= control target key end

     0   :  { %12 = vsyncpa [#allocation4], 0  ;;  %s576_s0 = inlined_call_operand.hbm [shape: f32[16,32], index: 0, kind: input, shape index: {}]   ;;  %s577_s1 = inlined_call_operand.hbm [shape: bf16[32,128], index: 1, kind: input, shape index: {}]   ;;  %s578_s2 = inlined_call_operand.vmem [shape: f32[1,128], index: 2, kind: input, shape index: {}]   ;;  %s579_s3 = inlined_call_operand.vmem [shape: f32[1,128], index: 3, kind: input, shape index: {}]   ;;  %s580_s4 = inlined_call_operand.vmem [shape: f32[1,128], index: 4, kind: input, shape index: {}]   ;;  %s581_s5 = inlined_call_operand.hbm [shape: bf16[128,128], index: 5, kind: input, shape index: {}]   ;;  %s582_s6 = inlined_call_operand.vmem [shape: f32[1,128], index: 6, kind: input, shape index: {}]   ;;  %s583_s7 = inlined_call_operand.hbm [shape: f32[16,128], index: 7, kind: output, shape index: {}]  }
   0x1   :  { %13 = vsyncpa [#allocation7], 0  ;;  %s32_s26 = sshll.u32 %s577_s1, 4  ;;  %s33_s26 = int_to_ptr.hbm [resolvable:$true] %s32_s26 }
   0x2   :  { %14 = vsyncpa [#allocation5], 0  ;;  %s485_s27 = smov [#allocation6]   ;;  %s19_s8 = sshll.u32 %s576_s0, 4  ;;  %s20_s8 = int_to_ptr.hbm [resolvable:$true] %s19_s8 }
   0x3   :  { %s34_s28 = sshll.u32 %s485_s27, 4  ;;  %s486_s9 = smov 64   ;;  %s35_s28 = int_to_ptr.vmem [resolvable:$true] %s34_s28 }
   0x4   :  { %s487_s10 = smov 4   ;;  %s488_s11 = smov [#allocation3]  }
   0x5   :  { %40 = dma.hbm_to_vmem [thread:$0]  %s33_s26, 256, %s35_s28, [#allocation7], %s486_s9, %s486_s9, %s487_s10  }
   0x6   :  { %s21_s12 = sshll.u32 %s488_s11, 4  ;;  %s489_s13 = smov 128   ;;  %s22_s12 = int_to_ptr.vmem [resolvable:$true] %s21_s12 }
   0x7   :  { %s490_s14 = smov 8   ;;  %s51_s16 = sshll.u32 %s581_s5, 4  ;;  %s52_s16 = int_to_ptr.hbm [resolvable:$true] %s51_s16 }
   0x8   :  { %27 = dma.hbm_to_vmem [thread:$0]  %s20_s8, 256, %s22_s12, [#allocation4], %s489_s13, %s489_s13, %s490_s14  }
   0x9   :  { %s491_s17 = smov [#allocation8]  }
   0xa   :  { %s53_s0 = sshll.u32 %s491_s17, 4  ;;  %s54_s0 = int_to_ptr.vmem [resolvable:$true] %s53_s0 }
   0xb   :  { %59 = dma.hbm_to_vmem [thread:$0]  %s52_s16, 1024, %s54_s0, [#allocation7], %s486_s9, %s486_s9, %s487_s10  }
   0xc   :  { %479 = dma.done.wait [#allocation4], 256  }
   0xd   :  { %480 = vsyncadd [#allocation4], 4294967040 }
   0xe   :  { %481 = dma.done.wait [#allocation7], 1280  }
   0xf   :  { %482 = vsyncadd [#allocation7], 4294966016  ;;  %v349_v0 = vld [vmem:[#allocation6 + $0x8] sm:$0xff]  ;;  %v348_v1 = vld [vmem:[#allocation6] sm:$0xff]  ;;  %vm102_vm0 = vcmask 261120   ;;  %v492_v12 = vmov 128.0  }
  0x10   :  { %v79_v2 = vld [vmem:[#allocation3] sm:$0xff]  ;;  %v80_v3 = vld [vmem:[#allocation3 + $0x8] sm:$0xff]  ;;  %112 = vmatpush.bf16.msra.mxu0 %v349_v0  ;;  %v373_v5 = vld [vmem:[%s578_s2] ss:$0 sm:$0xff]  ;;  %377 = vrcp.f32 %v492_v12  ;;  %s289_s26 = sshll.u32 %s583_s7, 4  ;;  %s290_s26 = int_to_ptr.hbm [resolvable:$true] %s289_s26 }
  0x11   :  { %v81_v4 = vpack.c.bf16 %v80_v3, %v79_v2  ;;  %v358_v17 = vld [vmem:[#allocation8 + $0x38] sm:$0xff]  ;;  %v357_v19 = vld [vmem:[#allocation8 + $0x30] sm:$0xff]  ;;  %v356_v22 = vld [vmem:[#allocation8 + $0x28] sm:$0xff] }
  0x12   :  { %267 = vmatpush.bf16.msra.mxu1 %v358_v17  ;;  %v355_v27 = vld [vmem:[#allocation8 + $0x20] sm:$0xff]  ;;  %v354_v31 = vld [vmem:[#allocation8 + $0x18] sm:$0xff]  ;;  %v353_v37 = vld [vmem:[#allocation8 + $0x10] sm:$0xff] }
  0x13   :  { %v352_v40 = vld [vmem:[#allocation8 + $0x8] sm:$0xff]  ;;  %v351_v44 = vld [vmem:[#allocation8] sm:$0xff]  ;;  %v374_v55 = vld [vmem:[%s579_s3] ss:$0 sm:$0xff] }
  0x14   :  { %113 = vmatpush.bf16.msra.mxu0 %v348_v1  ;;  %v375_v59 = vld [vmem:[%s580_s4] ss:$0 sm:$0xff]  ;;  %s493_s4 = smov [#allocation9]  }
  0x15   :  { %s287_s23 = sshll.u32 %s493_s4, 4  ;;  %s288_s23 = int_to_ptr.vmem [resolvable:$true] %s287_s23 }
  0x16   :  { %v378_v13 = vpop.eup %377  ;;  %268 = vmatpush.bf16.msra.mxu1 %v357_v19 }
  0x17   :  { %311 = vmatmul.msk.bf16.vlgmr.msra.gmra.mxu0 %vm102_vm0, %v81_v4  ;;  %v125_v14 = vmul.f32 128.0, %v378_v13  ;;  %vm129_vm1 = vweird.f32 %v378_v13 }
  0x19   :  { %v126_v15 = vsub.f32 1.0, %v125_v14 }
  0x1a   :  { %269 = vmatpush.bf16.msra.mxu1 %v356_v22 }
  0x1b   :  { %v127_v16 = vmul.f32 %v378_v13, %v126_v15 }
  0x1d   :  { %v128_v18 = vadd.f32 %v378_v13, %v127_v16 }
  0x1e   :  { %270 = vmatpush.bf16.msra.mxu1 %v355_v27 }
  0x1f   :  { %v130_v20 = vsel %vm129_vm1, %v378_v13, %v128_v18 }
  0x22   :  { %271 = vmatpush.bf16.msra.mxu1 %v354_v31 }
  0x26   :  { %272 = vmatpush.bf16.msra.mxu1 %v353_v37 }
  0x2a   :  { %273 = vmatpush.bf16.msra.mxu1 %v352_v40 }
  0x2e   :  { %274 = vmatpush.bf16.msra.mxu1 %v351_v44 }
  0x94   :  { %v115_v6 = vpop.f32.mrf.mxu0 }
  0x95   :  { %v549_v7 = vadd.f32 %v373_v5, %v115_v6 }
  0x97   :  { %120 = vadd.xlane.f32.xlu0 %v549_v7  ;;  %v133_v8 = vmul.f32 %v549_v7, %v549_v7 }
  0x99   :  { %135 = vadd.xlane.f32.xlu1 %v133_v8 }
  0x9c   :  { %v117_v9 = vpop.f32.mrf.mxu0 }
  0x9d   :  { %v554_v10 = vadd.f32 %v373_v5, %v117_v9 }
  0x9f   :  { %122 = vadd.xlane.f32.xlu0 %v554_v10  ;;  %v134_v11 = vmul.f32 %v554_v10, %v554_v10 }
  0xa1   :  { %137 = vadd.xlane.f32.xlu1 %v134_v11 }
 0x10a   :  { %v121_v21 = vpop.xlane.xlu0 %120 }
 0x10b   :  { %v131_v23 = vmul.f32 %v130_v20, %v121_v21 }
 0x10c   :  { %v136_v24 = vpop.xlane.xlu1 %135 }
 0x10d   :  { %v141_v25 = vmul.f32 %v131_v23, %v131_v23  ;;  %v139_v26 = vmul.f32 %v136_v24, %v130_v20  ;;  %v147_v53 = vsub.f32 %v549_v7, %v131_v23  ;;  %v376_v7 = vld [vmem:[%s582_s6] ss:$0 sm:$0xff] }
 0x10f   :  { %v143_v28 = vsub.f32 %v139_v26, %v141_v25 }
 0x111   :  { %v145_v29 = vmax.f32 %v143_v28, 0.0 }
 0x112   :  { %v123_v30 = vpop.xlane.xlu0 %122 }
 0x113   :  { %v149_v32 = vadd.f32 1e-05, %v145_v29  ;;  %v132_v33 = vmul.f32 %v130_v20, %v123_v30 }
 0x114   :  { %v138_v34 = vpop.xlane.xlu1 %137 }
 0x115   :  { %379 = vrsqrt.f32 %v149_v32  ;;  %v142_v35 = vmul.f32 %v132_v33, %v132_v33  ;;  %v140_v36 = vmul.f32 %v138_v34, %v130_v20  ;;  %vm157_vm3 = vweird.f32 %v149_v32 }
 0x116   :  { %v148_v61 = vsub.f32 %v554_v10, %v132_v33 }
 0x117   :  { %v144_v38 = vsub.f32 %v140_v36, %v142_v35 }
 0x119   :  { %v146_v39 = vmax.f32 %v144_v38, 0.0 }
 0x11b   :  { %v380_v41 = vpop.eup %379  ;;  %v150_v43 = vadd.f32 1e-05, %v146_v39 }
 0x11c   :  { %v152_v42 = vmul.f32 %v380_v41, %v149_v32  ;;  %vm158_vm2 = vweird.f32 %v380_v41 }
 0x11d   :  { %381 = vrsqrt.f32 %v150_v43  ;;  %vm159_vm4 = vmor %vm157_vm3, %vm158_vm2  ;;  %vm167_vm6 = vweird.f32 %v150_v43 }
 0x11e   :  { %v153_v45 = vmul.f32 %v380_v41, %v152_v42 }
 0x120   :  { %v154_v46 = vmul.f32 0.5, %v153_v45 }
 0x122   :  { %v155_v47 = vsub.f32 1.5, %v154_v46 }
 0x123   :  { %v382_v48 = vpop.eup %381 }
 0x124   :  { %v156_v49 = vmul.f32 %v380_v41, %v155_v47  ;;  %v162_v50 = vmul.f32 %v382_v48, %v150_v43  ;;  %vm168_vm5 = vweird.f32 %v382_v48 }
 0x125   :  { %vm169_vm7 = vmor %vm167_vm6, %vm168_vm5 }
 0x126   :  { %v160_v51 = vsel %vm159_vm4, %v380_v41, %v156_v49  ;;  %v163_v52 = vmul.f32 %v382_v48, %v162_v50 }
 0x127   :  { %v171_v56 = vmul.f32 %v160_v51, %v147_v53 }
 0x128   :  { %v164_v54 = vmul.f32 0.5, %v163_v52 }
 0x129   :  { %v177_v60 = vmul.f32 %v374_v55, %v171_v56 }
 0x12a   :  { %v165_v57 = vsub.f32 1.5, %v164_v54 }
 0x12b   :  { %v183_v0 = vadd.f32 %v375_v59, %v177_v60 }
 0x12c   :  { %v166_v58 = vmul.f32 %v382_v48, %v165_v57 }
 0x12d   :  { %v185_v3 = vmax.f32 %v183_v0, 0.0 }
 0x12e   :  { %v170_v62 = vsel %vm169_vm7, %v382_v48, %v166_v58 }
 0x12f   :  { %v172_v63 = vmul.f32 %v170_v62, %v148_v61 }
 0x131   :  { %v178_v1 = vmul.f32 %v374_v55, %v172_v63 }
 0x133   :  { %v184_v2 = vadd.f32 %v375_v59, %v178_v1 }
 0x135   :  { %v186_v4 = vmax.f32 %v184_v2, 0.0 }
 0x137   :  { %v362_v5 = vpack.c.bf16 %v186_v4, %v185_v3 }
 0x139   :  { %363 = vst [vmem:[#allocation2] sm:$0xff] %v362_v5  }
 0x140   :  { %v350_v6 = vld [vmem:[#allocation2] sm:$0xff] }
 0x141   :  { %275 = vmatmul.bf16.vlgmr.msra.gmra.mxu1 %v350_v6 }
 0x1be   :  { %v276_v8 = vpop.f32.mrf.mxu1 }
 0x1bf   :  { %v277_v9 = vadd.f32 %v376_v7, %v276_v8 }
 0x1c1   :  { %281 = vst [vmem:[#allocation9] sm:$0xff] %v277_v9 }
 0x1c6   :  { %v278_v10 = vpop.f32.mrf.mxu1 }
 0x1c7   :  { %v279_v11 = vadd.f32 %v376_v7, %v278_v10 }
 0x1c9   :  { %282 = vst [vmem:[#allocation9 + $0x8] sm:$0xff] %v279_v11 }
 0x1ca   :  { %295 = dma.vmem_to_hbm [thread:$0]  %s288_s23, 256, %s290_s26, [#allocation5], %s489_s13, %s489_s13, %s490_s14  }
 0x1cb   :  { %483 = dma.done.wait [#allocation5], 256  }
 0x1cc   :  { %484 = vsyncadd [#allocation5], 4294967040 }
 0x1cd   :  { %300 = vsyncpa [#allocation4], 1 }
 0x1ce   :  { %301 = vsyncpa [#allocation7], 1 }
 0x1cf   :  { %302 = vsyncpa [#allocation5], 1 }

// kernel: _projection_call.1
= control target key start
LH: loop header
LB: loop body
LE: loop exit
PB: predicated region body
PF: predicated region fallthrough
CT: control target
= control target key end

     0   :  { %12 = vsyncpa [#allocation4], 0  ;;  %s576_s0 = inlined_call_operand.hbm [shape: f32[16,32], index: 0, kind: input, shape index: {}]   ;;  %s577_s1 = inlined_call_operand.hbm [shape: bf16[32,128], index: 1, kind: input, shape index: {}]   ;;  %s578_s2 = inlined_call_operand.vmem [shape: f32[1,128], index: 2, kind: input, shape index: {}]   ;;  %s579_s3 = inlined_call_operand.vmem [shape: f32[1,128], index: 3, kind: input, shape index: {}]   ;;  %s580_s4 = inlined_call_operand.vmem [shape: f32[1,128], index: 4, kind: input, shape index: {}]   ;;  %s581_s5 = inlined_call_operand.hbm [shape: bf16[128,128], index: 5, kind: input, shape index: {}]   ;;  %s582_s6 = inlined_call_operand.vmem [shape: f32[1,128], index: 6, kind: input, shape index: {}]   ;;  %s583_s7 = inlined_call_operand.hbm [shape: f32[16,128], index: 7, kind: output, shape index: {}]  }
   0x1   :  { %13 = vsyncpa [#allocation7], 0  ;;  %s32_s26 = sshll.u32 %s577_s1, 4  ;;  %s33_s26 = int_to_ptr.hbm [resolvable:$true] %s32_s26 }
   0x2   :  { %14 = vsyncpa [#allocation5], 0  ;;  %s485_s27 = smov [#allocation6]   ;;  %s19_s8 = sshll.u32 %s576_s0, 4  ;;  %s20_s8 = int_to_ptr.hbm [resolvable:$true] %s19_s8 }
   0x3   :  { %s34_s28 = sshll.u32 %s485_s27, 4  ;;  %s486_s9 = smov 64   ;;  %s35_s28 = int_to_ptr.vmem [resolvable:$true] %s34_s28 }
   0x4   :  { %s487_s10 = smov 4   ;;  %s488_s11 = smov [#allocation3]  }
   0x5   :  { %40 = dma.hbm_to_vmem [thread:$0]  %s33_s26, 256, %s35_s28, [#allocation7], %s486_s9, %s486_s9, %s487_s10  }
   0x6   :  { %s21_s12 = sshll.u32 %s488_s11, 4  ;;  %s489_s13 = smov 128   ;;  %s22_s12 = int_to_ptr.vmem [resolvable:$true] %s21_s12 }
   0x7   :  { %s490_s14 = smov 8   ;;  %s51_s16 = sshll.u32 %s581_s5, 4  ;;  %s52_s16 = int_to_ptr.hbm [resolvable:$true] %s51_s16 }
   0x8   :  { %27 = dma.hbm_to_vmem [thread:$0]  %s20_s8, 256, %s22_s12, [#allocation4], %s489_s13, %s489_s13, %s490_s14  }
   0x9   :  { %s491_s17 = smov [#allocation8]  }
   0xa   :  { %s53_s0 = sshll.u32 %s491_s17, 4  ;;  %s54_s0 = int_to_ptr.vmem [resolvable:$true] %s53_s0 }
   0xb   :  { %59 = dma.hbm_to_vmem [thread:$0]  %s52_s16, 1024, %s54_s0, [#allocation7], %s486_s9, %s486_s9, %s487_s10  }
   0xc   :  { %479 = dma.done.wait [#allocation4], 256  }
   0xd   :  { %480 = vsyncadd [#allocation4], 4294967040 }
   0xe   :  { %481 = dma.done.wait [#allocation7], 1280  }
   0xf   :  { %482 = vsyncadd [#allocation7], 4294966016  ;;  %v349_v0 = vld [vmem:[#allocation6 + $0x8] sm:$0xff]  ;;  %v348_v1 = vld [vmem:[#allocation6] sm:$0xff]  ;;  %vm102_vm0 = vcmask 261120   ;;  %v492_v12 = vmov 128.0  }
  0x10   :  { %v79_v2 = vld [vmem:[#allocation3] sm:$0xff]  ;;  %v80_v3 = vld [vmem:[#allocation3 + $0x8] sm:$0xff]  ;;  %112 = vmatpush.bf16.msra.mxu0 %v349_v0  ;;  %v373_v5 = vld [vmem:[%s578_s2] ss:$0 sm:$0xff]  ;;  %377 = vrcp.f32 %v492_v12  ;;  %s289_s26 = sshll.u32 %s583_s7, 4  ;;  %s290_s26 = int_to_ptr.hbm [resolvable:$true] %s289_s26 }
  0x11   :  { %v81_v4 = vpack.c.bf16 %v80_v3, %v79_v2  ;;  %v358_v17 = vld [vmem:[#allocation8 + $0x38] sm:$0xff]  ;;  %v357_v19 = vld [vmem:[#allocation8 + $0x30] sm:$0xff]  ;;  %v356_v22 = vld [vmem:[#allocation8 + $0x28] sm:$0xff] }
  0x12   :  { %267 = vmatpush.bf16.msra.mxu1 %v358_v17  ;;  %v355_v27 = vld [vmem:[#allocation8 + $0x20] sm:$0xff]  ;;  %v354_v31 = vld [vmem:[#allocation8 + $0x18] sm:$0xff]  ;;  %v353_v37 = vld [vmem:[#allocation8 + $0x10] sm:$0xff] }
  0x13   :  { %v352_v40 = vld [vmem:[#allocation8 + $0x8] sm:$0xff]  ;;  %v351_v44 = vld [vmem:[#allocation8] sm:$0xff]  ;;  %v374_v55 = vld [vmem:[%s579_s3] ss:$0 sm:$0xff] }
  0x14   :  { %113 = vmatpush.bf16.msra.mxu0 %v348_v1  ;;  %v375_v59 = vld [vmem:[%s580_s4] ss:$0 sm:$0xff]  ;;  %s493_s4 = smov [#allocation9]  }
  0x15   :  { %s287_s23 = sshll.u32 %s493_s4, 4  ;;  %s288_s23 = int_to_ptr.vmem [resolvable:$true] %s287_s23 }
  0x16   :  { %v378_v13 = vpop.eup %377  ;;  %268 = vmatpush.bf16.msra.mxu1 %v357_v19 }
  0x17   :  { %311 = vmatmul.msk.bf16.vlgmr.msra.gmra.mxu0 %vm102_vm0, %v81_v4  ;;  %v125_v14 = vmul.f32 128.0, %v378_v13  ;;  %vm129_vm1 = vweird.f32 %v378_v13 }
  0x19   :  { %v126_v15 = vsub.f32 1.0, %v125_v14 }
  0x1a   :  { %269 = vmatpush.bf16.msra.mxu1 %v356_v22 }
  0x1b   :  { %v127_v16 = vmul.f32 %v378_v13, %v126_v15 }
  0x1d   :  { %v128_v18 = vadd.f32 %v378_v13, %v127_v16 }
  0x1e   :  { %270 = vmatpush.bf16.msra.mxu1 %v355_v27 }
  0x1f   :  { %v130_v20 = vsel %vm129_vm1, %v378_v13, %v128_v18 }
  0x22   :  { %271 = vmatpush.bf16.msra.mxu1 %v354_v31 }
  0x26   :  { %272 = vmatpush.bf16.msra.mxu1 %v353_v37 }
  0x2a   :  { %273 = vmatpush.bf16.msra.mxu1 %v352_v40 }
  0x2e   :  { %274 = vmatpush.bf16.msra.mxu1 %v351_v44 }
  0x94   :  { %v115_v6 = vpop.f32.mrf.mxu0 }
  0x95   :  { %v549_v7 = vadd.f32 %v373_v5, %v115_v6 }
  0x97   :  { %120 = vadd.xlane.f32.xlu0 %v549_v7  ;;  %v133_v8 = vmul.f32 %v549_v7, %v549_v7 }
  0x99   :  { %135 = vadd.xlane.f32.xlu1 %v133_v8 }
  0x9c   :  { %v117_v9 = vpop.f32.mrf.mxu0 }
  0x9d   :  { %v554_v10 = vadd.f32 %v373_v5, %v117_v9 }
  0x9f   :  { %122 = vadd.xlane.f32.xlu0 %v554_v10  ;;  %v134_v11 = vmul.f32 %v554_v10, %v554_v10 }
  0xa1   :  { %137 = vadd.xlane.f32.xlu1 %v134_v11 }
 0x10a   :  { %v121_v21 = vpop.xlane.xlu0 %120 }
 0x10b   :  { %v131_v23 = vmul.f32 %v130_v20, %v121_v21 }
 0x10c   :  { %v136_v24 = vpop.xlane.xlu1 %135 }
 0x10d   :  { %v141_v25 = vmul.f32 %v131_v23, %v131_v23  ;;  %v139_v26 = vmul.f32 %v136_v24, %v130_v20  ;;  %v147_v53 = vsub.f32 %v549_v7, %v131_v23  ;;  %v376_v7 = vld [vmem:[%s582_s6] ss:$0 sm:$0xff] }
 0x10f   :  { %v143_v28 = vsub.f32 %v139_v26, %v141_v25 }
 0x111   :  { %v145_v29 = vmax.f32 %v143_v28, 0.0 }
 0x112   :  { %v123_v30 = vpop.xlane.xlu0 %122 }
 0x113   :  { %v149_v32 = vadd.f32 1e-05, %v145_v29  ;;  %v132_v33 = vmul.f32 %v130_v20, %v123_v30 }
 0x114   :  { %v138_v34 = vpop.xlane.xlu1 %137 }
 0x115   :  { %379 = vrsqrt.f32 %v149_v32  ;;  %v142_v35 = vmul.f32 %v132_v33, %v132_v33  ;;  %v140_v36 = vmul.f32 %v138_v34, %v130_v20  ;;  %vm157_vm3 = vweird.f32 %v149_v32 }
 0x116   :  { %v148_v61 = vsub.f32 %v554_v10, %v132_v33 }
 0x117   :  { %v144_v38 = vsub.f32 %v140_v36, %v142_v35 }
 0x119   :  { %v146_v39 = vmax.f32 %v144_v38, 0.0 }
 0x11b   :  { %v380_v41 = vpop.eup %379  ;;  %v150_v43 = vadd.f32 1e-05, %v146_v39 }
 0x11c   :  { %v152_v42 = vmul.f32 %v380_v41, %v149_v32  ;;  %vm158_vm2 = vweird.f32 %v380_v41 }
 0x11d   :  { %381 = vrsqrt.f32 %v150_v43  ;;  %vm159_vm4 = vmor %vm157_vm3, %vm158_vm2  ;;  %vm167_vm6 = vweird.f32 %v150_v43 }
 0x11e   :  { %v153_v45 = vmul.f32 %v380_v41, %v152_v42 }
 0x120   :  { %v154_v46 = vmul.f32 0.5, %v153_v45 }
 0x122   :  { %v155_v47 = vsub.f32 1.5, %v154_v46 }
 0x123   :  { %v382_v48 = vpop.eup %381 }
 0x124   :  { %v156_v49 = vmul.f32 %v380_v41, %v155_v47  ;;  %v162_v50 = vmul.f32 %v382_v48, %v150_v43  ;;  %vm168_vm5 = vweird.f32 %v382_v48 }
 0x125   :  { %vm169_vm7 = vmor %vm167_vm6, %vm168_vm5 }
 0x126   :  { %v160_v51 = vsel %vm159_vm4, %v380_v41, %v156_v49  ;;  %v163_v52 = vmul.f32 %v382_v48, %v162_v50 }
 0x127   :  { %v171_v56 = vmul.f32 %v160_v51, %v147_v53 }
 0x128   :  { %v164_v54 = vmul.f32 0.5, %v163_v52 }
 0x129   :  { %v177_v60 = vmul.f32 %v374_v55, %v171_v56 }
 0x12a   :  { %v165_v57 = vsub.f32 1.5, %v164_v54 }
 0x12b   :  { %v183_v0 = vadd.f32 %v375_v59, %v177_v60 }
 0x12c   :  { %v166_v58 = vmul.f32 %v382_v48, %v165_v57 }
 0x12d   :  { %v185_v3 = vmax.f32 %v183_v0, 0.0 }
 0x12e   :  { %v170_v62 = vsel %vm169_vm7, %v382_v48, %v166_v58 }
 0x12f   :  { %v172_v63 = vmul.f32 %v170_v62, %v148_v61 }
 0x131   :  { %v178_v1 = vmul.f32 %v374_v55, %v172_v63 }
 0x133   :  { %v184_v2 = vadd.f32 %v375_v59, %v178_v1 }
 0x135   :  { %v186_v4 = vmax.f32 %v184_v2, 0.0 }
 0x137   :  { %v362_v5 = vpack.c.bf16 %v186_v4, %v185_v3 }
 0x139   :  { %363 = vst [vmem:[#allocation2] sm:$0xff] %v362_v5  }
 0x140   :  { %v350_v6 = vld [vmem:[#allocation2] sm:$0xff] }
 0x141   :  { %275 = vmatmul.bf16.vlgmr.msra.gmra.mxu1 %v350_v6 }
 0x1be   :  { %v276_v8 = vpop.f32.mrf.mxu1 }
 0x1bf   :  { %v277_v9 = vadd.f32 %v376_v7, %v276_v8 }
 0x1c1   :  { %281 = vst [vmem:[#allocation9] sm:$0xff] %v277_v9 }
 0x1c6   :  { %v278_v10 = vpop.f32.mrf.mxu1 }
 0x1c7   :  { %v279_v11 = vadd.f32 %v376_v7, %v278_v10 }
 0x1c9   :  { %282 = vst [vmem:[#allocation9 + $0x8] sm:$0xff] %v279_v11 }
 0x1ca   :  { %295 = dma.vmem_to_hbm [thread:$0]  %s288_s23, 256, %s290_s26, [#allocation5], %s489_s13, %s489_s13, %s490_s14  }
 0x1cb   :  { %483 = dma.done.wait [#allocation5], 256  }
 0x1cc   :  { %484 = vsyncadd [#allocation5], 4294967040 }
 0x1cd   :  { %300 = vsyncpa [#allocation4], 1 }
 0x1ce   :  { %301 = vsyncpa [#allocation7], 1 }
 0x1cf   :  { %302 = vsyncpa [#allocation5], 1 }

</bundles_post_ra>
